<compile_context>
chip_gen: v5e
topology: v5e:2x2
jax: 0.10.0
libtpu: 0.0.40
codegen_flags: <defaults>
</compile_context>

<pallas_src>
import jax
import jax.numpy as jnp
from jax.experimental import pallas as pl
from jax.experimental.pallas import tpu as pltpu

HIDDEN = 100
HIDDEN_PAD = 128
BIAS_ROW = HIDDEN          # padded hidden row 100 carries the folded biases
MAX_TM = 4096              # v7x-safe batch tile (64 MiB VMEM); fine on v5e/v6e


def _mlp_kernel(x_ref, w1_ref, b1_ref, w2_ref, w3_ref, o_ref):
    # x_ref: (1, TM) f32 -- batch along lanes
    # w1/b1/w3: (128, 1) f32, w2: (128, 128) bf16 in (out, in) layout
    # o_ref: (1, TM) f32
    x = x_ref[...]                                                    # (1, TM)

    # layer 1 (K=1): outer product + bias + ReLU on the VPU (f32, v5e-safe).
    # Row BIAS_ROW has w1=0, b1=1 -> h1[BIAS_ROW] == 1 (bias path).
    h1 = jnp.maximum(w1_ref[...] * x + b1_ref[...], 0.0)             # (128, TM)

    # layer 2: the only real matmul -> MXU, bf16 operands, f32 accumulation.
    # b2 is folded into w2[:, BIAS_ROW], so no broadcast bias add is needed.
    h2 = jnp.maximum(
        jnp.dot(w2_ref[...], h1.astype(jnp.bfloat16),
                preferred_element_type=jnp.float32),
        0.0)                                                          # (128, TM)

    # layer 3 (N=1): VPU multiply + cross-sublane reduction.
    # b3 is folded into w3[BIAS_ROW] (h2[BIAS_ROW] == 1 exactly).
    o_ref[...] = jnp.sum(h2 * w3_ref[...], axis=0,
                         keepdims=True).astype(o_ref.dtype)           # (1, TM)


def prepare_kernel_params(params):
    """One-time prep: pad hidden 100 -> 128, transpose to (out, in), fold the
    layer-2/3 biases into the padded bias row, cast w2 to bf16 (MXU operand).
    Zero padding is exact: padded h1/h2 rows stay 0 through ReLU and padded
    w3 rows contribute 0 to the output."""
    f32 = jnp.float32
    H, HP, B = HIDDEN, HIDDEN_PAD, BIAS_ROW

    w1 = jnp.zeros((HP, 1), f32).at[:H, 0].set(params["w1"][0, :])
    b1 = jnp.zeros((HP, 1), f32).at[:H, 0].set(params["b1"][0, :])
    b1 = b1.at[B, 0].set(1.0)                         # h1[B] == 1 after ReLU

    w2 = jnp.zeros((HP, HP), f32).at[:H, :H].set(params["w2"].T)   # (out, in)
    w2 = w2.at[:H, B].set(params["b2"][0, :])         # fold b2 (rounds to bf16)
    w2 = w2.at[B, B].set(1.0)                         # keep bias path: h2[B]==1
    w2 = w2.astype(jnp.bfloat16)                      # MXU operand only

    w3 = jnp.zeros((HP, 1), f32).at[:H, 0].set(params["w3"][:, 0])
    w3 = w3.at[B, 0].set(params["b3"][0, 0])          # fold b3 (exact, f32)

    return {"w1": w1, "b1": b1, "w2": w2, "w3": w3}


def linear_regression_model(x, kparams):
    """x: (N, 1) float32. kparams from prepare_kernel_params().
    Returns (N, 1) float32."""
    n = x.shape[0]
    f32 = jnp.float32
    HP = HIDDEN_PAD

    # --- batch tile: large (amortize ~0.35us/step), v7x-capped, >=2 steps when
    #     the batch allows it so both v7x TensorCores get a share ---
    n128 = ((n + 127) // 128) * 128
    tm = min(MAX_TM, n128)
    if n128 > 128 and n128 // tm < 2:
        tm = ((n128 // 2 + 127) // 128) * 128
    n_pad = pl.cdiv(n, tm) * tm

    # --- batch along lanes: (N, 1) -> (1, N_pad), lane-dense I/O ---
    xr = jnp.zeros((1, n_pad), f32).at[0, :n].set(x[:, 0].astype(f32))

    const = lambda i: (0, 0)   # weights resident across all grid steps
    out = pl.pallas_call(
        _mlp_kernel,
        out_shape=jax.ShapeDtypeStruct((1, n_pad), f32),
        grid=(n_pad // tm,),
        in_specs=[
            pl.BlockSpec((1, tm), lambda i: (0, i)),   # x tile
            pl.BlockSpec((HP, 1), const),              # w1
            pl.BlockSpec((HP, 1), const),              # b1 (+ bias-row 1.0)
            pl.BlockSpec((HP, HP), const),             # w2 (bf16, b2 folded)
            pl.BlockSpec((HP, 1), const),              # w3 (b3 folded)
        ],
        out_specs=pl.BlockSpec((1, tm), lambda i: (0, i)),
        compiler_params=pltpu.CompilerParams(
            dimension_semantics=("parallel",)),
    )(xr, kparams["w1"], kparams["b1"], kparams["w2"], kparams["w3"])

    return out[0, :n].reshape(n, 1)


def init_params(key):
    """Deterministic init mimicking PyTorch's default Linear init:
    U(-1/sqrt(fan_in), 1/sqrt(fan_in)) for both weights and biases."""
    k1, k2, k3, k4, k5, k6 = jax.random.split(key, 6)

    def uniform(k, shape, fan_in):
        bound = 1.0 / jnp.sqrt(jnp.float32(fan_in))
        return jax.random.uniform(k, shape, jnp.float32, -bound, bound)

    return {
        # stored as (in_features, out_features); biases as (1, out_features)
        "w1": uniform(k1, (1, 100), 1),
        "b1": uniform(k2, (1, 100), 1),
        "w2": uniform(k3, (100, 100), 100),
        "b2": uniform(k4, (1, 100), 100),
        "w3": uniform(k5, (100, 1), 100),
        "b3": uniform(k6, (1, 1), 100),
    }


def _reference(x, params, bf16_layer2):
    """Pure-elementwise reference (no matmul-precision ambiguity).
    With bf16_layer2=True it reproduces the kernel's numerics (bf16 MXU
    operands with b2 folded -> b2 rounded through bf16, f32 accumulation)."""
    h1 = jnp.maximum(x * params["w1"] + params["b1"], 0.0)           # (n, 100)
    if bf16_layer2:
        h1m = h1.astype(jnp.bfloat16).astype(jnp.float32)
        w2m = params["w2"].astype(jnp.bfloat16).astype(jnp.float32)
        b2m = params["b2"].astype(jnp.bfloat16).astype(jnp.float32)
    else:
        h1m, w2m, b2m = h1, params["w2"], params["b2"]
    h2 = jnp.sum(h1m[:, :, None] * w2m[None, :, :], axis=1) + b2m
    h2 = jnp.maximum(h2, 0.0)                                        # (n, 100)
    y = jnp.sum(h2 * params["w3"][:, 0][None, :], axis=1, keepdims=True)
    return y + params["b3"]                                          # (n, 1)


if __name__ == "__main__":
    key = jax.random.PRNGKey(0)
    pkey, xkey = jax.random.split(key)

    params = init_params(pkey)
    kparams = prepare_kernel_params(params)   # hoisted one-time weight prep
    x = jax.random.normal(xkey, (8, 1), dtype=jnp.float32)  # batch=8, in=1

    out = linear_regression_model(x, kparams)
    out = jax.block_until_ready(out)

    assert out.shape == (8, 1)
    # tight check against a reference matching the kernel's bf16 layer-2 path
    ref_bf16 = _reference(x, params, bf16_layer2=True)
    assert jnp.allclose(out, ref_bf16, atol=1e-4, rtol=1e-4)
    # loose check against the pure-f32 PyTorch-semantics forward
    ref_f32 = _reference(x, params, bf16_layer2=False)
    assert jnp.allclose(out, ref_f32, atol=5e-2, rtol=5e-2)

    print("KERNEL_OK")
</pallas_src>

<mosaic_0001>
module attributes {stable_mosaic.version = 11 : i64} {
  func.func @_mlp_kernel(%arg0: i32, %arg1: memref<1x128xf32, #tpu.memory_space<vmem>>, %arg2: memref<128x1xf32, #tpu.memory_space<vmem>>, %arg3: memref<128x1xf32, #tpu.memory_space<vmem>>, %arg4: memref<128x128xbf16, #tpu.memory_space<vmem>>, %arg5: memref<128x1xf32, #tpu.memory_space<vmem>>, %arg6: memref<1x128xf32, #tpu.memory_space<vmem>>) attributes {dimension_semantics = [#tpu.dimension_semantics<parallel>], iteration_bounds = array<i64: 1>, scalar_prefetch = 0 : i64, scratch_operands = 0 : i64, tpu.core_type = #tpu.core_type<tc>, window_params = [{transform_indices = @transform_0, window_bounds = array<i64: 1, 128>}, {pipeline_mode = #tpu.pipeline_mode<synchronous>, transform_indices = @transform_1, window_bounds = array<i64: 128, 1>}, {pipeline_mode = #tpu.pipeline_mode<synchronous>, transform_indices = @transform_2, window_bounds = array<i64: 128, 1>}, {pipeline_mode = #tpu.pipeline_mode<synchronous>, transform_indices = @transform_3, window_bounds = array<i64: 128, 128>}, {pipeline_mode = #tpu.pipeline_mode<synchronous>, transform_indices = @transform_4, window_bounds = array<i64: 128, 1>}, {transform_indices = @transform_5, window_bounds = array<i64: 1, 128>}]} {
    %c0 = arith.constant 0 : index
    %c0_0 = arith.constant 0 : index
    %0 = vector.load %arg1[%c0, %c0_0] : memref<1x128xf32, #tpu.memory_space<vmem>>, vector<1x128xf32>
    %c0_1 = arith.constant 0 : index
    %c0_2 = arith.constant 0 : index
    %1 = vector.load %arg2[%c0_1, %c0_2] : memref<128x1xf32, #tpu.memory_space<vmem>>, vector<128x1xf32>
    %2 = vector.broadcast %1 : vector<128x1xf32> to vector<128x128xf32>
    %3 = vector.broadcast %0 : vector<1x128xf32> to vector<128x128xf32>
    %4 = arith.mulf %2, %3 : vector<128x128xf32>
    %c0_3 = arith.constant 0 : index
    %c0_4 = arith.constant 0 : index
    %5 = vector.load %arg3[%c0_3, %c0_4] : memref<128x1xf32, #tpu.memory_space<vmem>>, vector<128x1xf32>
    %6 = vector.broadcast %5 : vector<128x1xf32> to vector<128x128xf32>
    %7 = arith.addf %4, %6 : vector<128x128xf32>
    %cst = arith.constant 0.000000e+00 : f32
    %8 = vector.broadcast %cst : f32 to vector<128x128xf32>
    %9 = arith.maximumf %7, %8 : vector<128x128xf32>
    %c0_5 = arith.constant 0 : index
    %c0_6 = arith.constant 0 : index
    %10 = vector.load %arg4[%c0_5, %c0_6] : memref<128x128xbf16, #tpu.memory_space<vmem>>, vector<128x128xbf16>
    %11 = arith.truncf %9 : vector<128x128xf32> to vector<128x128xbf16>
    %cst_7 = arith.constant dense<0.000000e+00> : vector<128x128xf32>
    %12 = tpu.matmul %10, %11, %cst_7 {dimension_numbers = #tpu.dot_dimension_numbers<[1], [0], [0], [1], [0, 0, 1, 1], [], []>} : vector<128x128xbf16>, vector<128x128xbf16>, vector<128x128xf32> -> vector<128x128xf32>
    %cst_8 = arith.constant 0.000000e+00 : f32
    %13 = vector.broadcast %cst_8 : f32 to vector<128x128xf32>
    %14 = arith.maximumf %12, %13 : vector<128x128xf32>
    %c0_9 = arith.constant 0 : index
    %c0_10 = arith.constant 0 : index
    %15 = vector.load %arg5[%c0_9, %c0_10] : memref<128x1xf32, #tpu.memory_space<vmem>>, vector<128x1xf32>
    %16 = vector.broadcast %15 : vector<128x1xf32> to vector<128x128xf32>
    %17 = arith.mulf %14, %16 : vector<128x128xf32>
    %cst_11 = arith.constant dense<0.000000e+00> : vector<128xf32>
    %18 = vector.multi_reduction <add>, %17, %cst_11 [0] : vector<128x128xf32> to vector<128xf32>
    %19 = vector.shape_cast %18 : vector<128xf32> to vector<1x128xf32>
    %c0_12 = arith.constant 0 : index
    %c0_13 = arith.constant 0 : index
    %20 = vector.load %arg6[%c0_12, %c0_13] : memref<1x128xf32, #tpu.memory_space<vmem>>, vector<1x128xf32>
    tpu.vector_store %arg6[%c0_12, %c0_13], %19 {strides = array<i32>} : memref<1x128xf32, #tpu.memory_space<vmem>>, vector<1x128xf32>,
    return
  }
  func.func @transform_0(%arg0: i32) -> (i32, i32) {
    %c0_i32 = arith.constant 0 : i32
    %c0_i32_0 = arith.constant 0 : i32
    return %c0_i32, %arg0 : i32, i32
  }
  func.func @transform_1(%arg0: i32) -> (i32, i32) {
    %c0_i32 = arith.constant 0 : i32
    %c0_i32_0 = arith.constant 0 : i32
    %c0_i32_1 = arith.constant 0 : i32
    return %c0_i32, %c0_i32_0 : i32, i32
  }
  func.func @transform_2(%arg0: i32) -> (i32, i32) {
    %c0_i32 = arith.constant 0 : i32
    %c0_i32_0 = arith.constant 0 : i32
    %c0_i32_1 = arith.constant 0 : i32
    return %c0_i32, %c0_i32_0 : i32, i32
  }
  func.func @transform_3(%arg0: i32) -> (i32, i32) {
    %c0_i32 = arith.constant 0 : i32
    %c0_i32_0 = arith.constant 0 : i32
    %c0_i32_1 = arith.constant 0 : i32
    return %c0_i32, %c0_i32_0 : i32, i32
  }
  func.func @transform_4(%arg0: i32) -> (i32, i32) {
    %c0_i32 = arith.constant 0 : i32
    %c0_i32_0 = arith.constant 0 : i32
    %c0_i32_1 = arith.constant 0 : i32
    return %c0_i32, %c0_i32_0 : i32, i32
  }
  func.func @transform_5(%arg0: i32) -> (i32, i32) {
    %c0_i32 = arith.constant 0 : i32
    %c0_i32_0 = arith.constant 0 : i32
    return %c0_i32, %arg0 : i32, i32
  }
}

</mosaic_0001>

<bundles_post_ra>
// kernel: tpu_custom_call.1
= control target key start
LH: loop header
LB: loop body
LE: loop exit
PB: predicated region body
PF: predicated region fallthrough
CT: control target
= control target key end

     0   :  { %v648_v3 = vmov 0   ;;  %s881_s0 = inlined_call_operand.vmem [shape: f32[1,128], index: 0, kind: input, shape index: {}]   ;;  %s882_s1 = inlined_call_operand.vmem [shape: f32[128,1], index: 1, kind: input, shape index: {}]   ;;  %s883_s2 = inlined_call_operand.vmem [shape: f32[128,1], index: 2, kind: input, shape index: {}]   ;;  %s884_s3 = inlined_call_operand.vmem [shape: bf16[128,128], index: 3, kind: input, shape index: {}]   ;;  %s885_s4 = inlined_call_operand.vmem [shape: f32[128,1], index: 4, kind: input, shape index: {}]   ;;  %s886_s5 = inlined_call_operand.hbm [shape: f32[1,128], index: 5, kind: output, shape index: {}]  }
   0x1   :  { %v37_v0 = vld [vmem:[%s882_s1 + $0x78] sm:$0xff]  ;;  %v24_v1 = vld [vmem:[%s882_s1 + $0x10] sm:$0xff]  ;;  %v22_v2 = vld [vmem:[%s882_s1] sm:$0xff]  ;;  %620 = vset.pattern.permute.xlu2 %v648_v3  ;;  %619 = vset.pattern.permute.xlu1 %v648_v3 }
   0x2   :  { %618 = vset.pattern.permute.xlu0 %v648_v3  ;;  %115 = vperm.xlu2 %620, %v37_v0  }
   0x3   :  { %50 = vperm.xlu1 %619, %v24_v1   ;;  %40 = vperm.xlu0 %618, %v22_v2  }
   0x4   :  { %10 = vsyncpa [#allocation3], 0  ;;  %v151_v4 = vld [vmem:[%s883_s2 + $0x70] sm:$0xff]  ;;  %v23_v6 = vld [vmem:[%s882_s1 + $0x8] sm:$0xff]  ;;  %s543_s29 = sshll.u32 %s886_s5, 4  ;;  %s544_s29 = int_to_ptr.hbm [resolvable:$true] %s543_s29 }
   0x5   :  { %v36_v5 = vld [vmem:[%s882_s1 + $0x70] sm:$0xff]  ;;  %v35_v7 = vld [vmem:[%s882_s1 + $0x68] sm:$0xff]  ;;  %v34_v8 = vld [vmem:[%s882_s1 + $0x60] sm:$0xff] }
   0x6   :  { %v152_v9 = vld [vmem:[%s883_s2 + $0x78] sm:$0xff]  ;;  %v32_v10 = vld [vmem:[%s882_s1 + $0x50] sm:$0xff]  ;;  %v150_v11 = vld [vmem:[%s883_s2 + $0x68] sm:$0xff] }
   0x7   :  { %v149_v12 = vld [vmem:[%s883_s2 + $0x60] sm:$0xff]  ;;  %v148_v13 = vld [vmem:[%s883_s2 + $0x58] sm:$0xff]  ;;  %v147_v14 = vld [vmem:[%s883_s2 + $0x50] sm:$0xff] }
   0x8   :  { %v33_v15 = vld [vmem:[%s882_s1 + $0x58] sm:$0xff]  ;;  %v145_v16 = vld [vmem:[%s883_s2 + $0x40] sm:$0xff]  ;;  %v31_v17 = vld [vmem:[%s882_s1 + $0x48] sm:$0xff] }
   0x9   :  { %v30_v18 = vld [vmem:[%s882_s1 + $0x40] sm:$0xff]  ;;  %v29_v19 = vld [vmem:[%s882_s1 + $0x38] sm:$0xff]  ;;  %v28_v20 = vld [vmem:[%s882_s1 + $0x30] sm:$0xff] }
   0xa   :  { %225 = vperm.xlu2 %620, %v151_v4   ;;  %v146_v21 = vld [vmem:[%s883_s2 + $0x48] sm:$0xff]  ;;  %v26_v22 = vld [vmem:[%s882_s1 + $0x20] sm:$0xff]  ;;  %v144_v23 = vld [vmem:[%s883_s2 + $0x38] sm:$0xff] }
   0xb   :  { %110 = vperm.xlu1 %619, %v36_v5   ;;  %45 = vperm.xlu0 %618, %v23_v6   ;;  %v143_v24 = vld [vmem:[%s883_s2 + $0x30] sm:$0xff]  ;;  %v142_v25 = vld [vmem:[%s883_s2 + $0x28] sm:$0xff]  ;;  %v141_v26 = vld [vmem:[%s883_s2 + $0x20] sm:$0xff] }
   0xc   :  { %v27_v27 = vld [vmem:[%s882_s1 + $0x28] sm:$0xff]  ;;  %v140_v28 = vld [vmem:[%s883_s2 + $0x18] sm:$0xff]  ;;  %v139_v29 = vld [vmem:[%s883_s2 + $0x10] sm:$0xff] }
   0xd   :  { %v25_v30 = vld [vmem:[%s882_s1 + $0x18] sm:$0xff]  ;;  %v402_v31 = vld [vmem:[%s885_s4] sm:$0xff]  ;;  %v138_v32 = vld [vmem:[%s883_s2 + $0x8] sm:$0xff] }
   0xe   :  { %v137_v33 = vld [vmem:[%s883_s2] sm:$0xff]  ;;  %v405_v34 = vld [vmem:[%s885_s4 + $0x18] sm:$0xff]  ;;  %v404_v35 = vld [vmem:[%s885_s4 + $0x10] sm:$0xff] }
   0xf   :  { %v403_v36 = vld [vmem:[%s885_s4 + $0x8] sm:$0xff]  ;;  %v408_v37 = vld [vmem:[%s885_s4 + $0x30] sm:$0xff]  ;;  %v406_v39 = vld [vmem:[%s885_s4 + $0x20] sm:$0xff] }
  0x10   :  { %v407_v38 = vld [vmem:[%s885_s4 + $0x28] sm:$0xff]  ;;  %v410_v42 = vld [vmem:[%s885_s4 + $0x40] sm:$0xff]  ;;  %v409_v43 = vld [vmem:[%s885_s4 + $0x38] sm:$0xff] }
  0x11   :  { %v411_v41 = vld [vmem:[%s885_s4 + $0x48] sm:$0xff]  ;;  %v414_v45 = vld [vmem:[%s885_s4 + $0x60] sm:$0xff]  ;;  %v413_v46 = vld [vmem:[%s885_s4 + $0x58] sm:$0xff] }
  0x12   :  { %105 = vperm.xlu2 %620, %v35_v7   ;;  %v412_v47 = vld [vmem:[%s885_s4 + $0x50] sm:$0xff]  ;;  %v818_v48 = vld [vmem:[%s881_s0] ss:$0 sm:$0xff]  ;;  %v417_v52 = vld [vmem:[%s885_s4 + $0x78] sm:$0xff] }
  0x13   :  { %100 = vperm.xlu1 %619, %v34_v8   ;;  %230 = vperm.xlu0 %618, %v152_v9   ;;  %v416_v54 = vld [vmem:[%s885_s4 + $0x70] sm:$0xff]  ;;  %v415_v55 = vld [vmem:[%s885_s4 + $0x68] sm:$0xff] }
  0x1a   :  { %90 = vperm.xlu2 %620, %v32_v10  }
  0x1b   :  { %220 = vperm.xlu1 %619, %v150_v11   ;;  %215 = vperm.xlu0 %618, %v149_v12  }
  0x22   :  { %210 = vperm.xlu2 %620, %v148_v13  }
  0x23   :  { %205 = vperm.xlu1 %619, %v147_v14   ;;  %95 = vperm.xlu0 %618, %v33_v15  }
  0x2a   :  { %195 = vperm.xlu2 %620, %v145_v16  }
  0x2b   :  { %85 = vperm.xlu1 %619, %v31_v17   ;;  %80 = vperm.xlu0 %618, %v30_v18  }
  0x32   :  { %75 = vperm.xlu2 %620, %v29_v19  }
  0x33   :  { %70 = vperm.xlu1 %619, %v28_v20   ;;  %200 = vperm.xlu0 %618, %v146_v21  }
  0x3a   :  { %60 = vperm.xlu2 %620, %v26_v22  }
  0x3b   :  { %190 = vperm.xlu1 %619, %v144_v23   ;;  %185 = vperm.xlu0 %618, %v143_v24  }
  0x42   :  { %180 = vperm.xlu2 %620, %v142_v25  }
  0x43   :  { %175 = vperm.xlu1 %619, %v141_v26   ;;  %65 = vperm.xlu0 %618, %v27_v27  }
  0x4a   :  { %170 = vperm.xlu2 %620, %v140_v28  }
  0x4b   :  { %165 = vperm.xlu1 %619, %v139_v29   ;;  %55 = vperm.xlu0 %618, %v25_v30  }
  0x52   :  { %420 = vperm.xlu2 %620, %v402_v31  }
  0x53   :  { %160 = vperm.xlu1 %619, %v138_v32   ;;  %155 = vperm.xlu0 %618, %v137_v33  }
  0x5a   :  { %435 = vperm.xlu2 %620, %v405_v34  }
  0x5b   :  { %430 = vperm.xlu1 %619, %v404_v35   ;;  %425 = vperm.xlu0 %618, %v403_v36  }
  0x5c   :  { %v116_v40 = vpop.permute.xlu2 %115 }
  0x5d   :  { %v136_v61 = vmul.f32 %v818_v48, %v116_v40 }
  0x62   :  { %450 = vperm.xlu2 %620, %v408_v37  }
  0x63   :  { %445 = vperm.xlu1 %619, %v407_v38   ;;  %440 = vperm.xlu0 %618, %v406_v39  }
  0x64   :  { %v226_v44 = vpop.permute.xlu2 %225 }
  0x6a   :  { %465 = vperm.xlu2 %620, %v411_v41  }
  0x6b   :  { %460 = vperm.xlu1 %619, %v410_v42   ;;  %455 = vperm.xlu0 %618, %v409_v43  }
  0x6c   :  { %v106_v53 = vpop.permute.xlu2 %105 }
  0x6d   :  { %v134_v5 = vmul.f32 %v818_v48, %v106_v53 }
  0x72   :  { %480 = vperm.xlu2 %620, %v414_v45  }
  0x73   :  { %475 = vperm.xlu1 %619, %v413_v46   ;;  %470 = vperm.xlu0 %618, %v412_v47  }
  0x74   :  { %v91_v60 = vpop.permute.xlu2 %90 }
  0x75   :  { %v820_v49 = vpop.permute.xlu1 %50  ;;  %v41_v50 = vpop.permute.xlu0 %40  ;;  %v131_v15 = vmul.f32 %v818_v48, %v91_v60 }
  0x76   :  { %v823_v51 = vmul.f32 %v818_v48, %v41_v50  ;;  %v123_v60 = vmul.f32 %v818_v48, %v820_v49 }
  0x7a   :  { %495 = vperm.xlu2 %620, %v417_v52  }
  0x7b   :  { %490 = vperm.xlu1 %619, %v416_v54   ;;  %485 = vperm.xlu0 %618, %v415_v55  }
  0x7c   :  { %v211_v6 = vpop.permute.xlu2 %210 }
  0x7d   :  { %v111_v56 = vpop.permute.xlu1 %110  ;;  %v46_v57 = vpop.permute.xlu0 %45 }
  0x7e   :  { %v835_v58 = vmul.f32 %v818_v48, %v46_v57  ;;  %v135_v59 = vmul.f32 %v818_v48, %v111_v56 }
  0x80   :  { %v247_v62 = vadd.f32 %v226_v44, %v135_v59 }
  0x82   :  { %v263_v2 = vmax.f32 %v247_v62, 0.0 }
  0x84   :  { %v196_v18 = vpop.permute.xlu2 %195 }
  0x85   :  { %v101_v63 = vpop.permute.xlu1 %100  ;;  %v231_v0 = vpop.permute.xlu0 %230 }
  0x86   :  { %v248_v1 = vadd.f32 %v231_v0, %v136_v61  ;;  %v133_v7 = vmul.f32 %v818_v48, %v101_v63 }
  0x88   :  { %v264_v3 = vmax.f32 %v248_v1, 0.0 }
  0x8a   :  { %v288_v4 = vpack.c.bf16 %v264_v3, %v263_v2 }
  0x8c   :  { %337 = vmatpush.bf16.msra.mxu0 %v288_v4  ;;  %592 = vmatpush.bf16.msra.mxu1 %v288_v4  ;;  %v76_v27 = vpop.permute.xlu2 %75 }
  0x8d   :  { %593 = vmatpush.bf16.msra.mxu2 %v288_v4  ;;  %594 = vmatpush.bf16.msra.mxu3 %v288_v4  ;;  %v221_v8 = vpop.permute.xlu1 %220  ;;  %v216_v9 = vpop.permute.xlu0 %215  ;;  %v128_v38 = vmul.f32 %v818_v48, %v76_v27 }
  0x8e   :  { %v246_v10 = vadd.f32 %v221_v8, %v134_v5  ;;  %v245_v11 = vadd.f32 %v216_v9, %v133_v7 }
  0x90   :  { %v262_v12 = vmax.f32 %v246_v10, 0.0  ;;  %v261_v13 = vmax.f32 %v245_v11, 0.0 }
  0x92   :  { %v287_v14 = vpack.c.bf16 %v262_v12, %v261_v13  ;;  %v584_v12 = vld [vmem:[%s884_s3] sm:$0xff]  ;;  %v586_v13 = vld [vmem:[%s884_s3 + $0x10] sm:$0xff] }
  0x94   :  { %338 = vmatpush.bf16.msra.mxu0 %v287_v14  ;;  %595 = vmatpush.bf16.msra.mxu1 %v287_v14  ;;  %v61_v36 = vpop.permute.xlu2 %60 }
  0x95   :  { %596 = vmatpush.bf16.msra.mxu2 %v287_v14  ;;  %597 = vmatpush.bf16.msra.mxu3 %v287_v14  ;;  %v206_v16 = vpop.permute.xlu1 %205  ;;  %v96_v17 = vpop.permute.xlu0 %95  ;;  %v125_v47 = vmul.f32 %v818_v48, %v61_v36  ;;  %v585_v14 = vld [vmem:[%s884_s3 + $0x8] sm:$0xff] }
  0x96   :  { %v243_v19 = vadd.f32 %v206_v16, %v131_v15  ;;  %v132_v20 = vmul.f32 %v818_v48, %v96_v17  ;;  %v587_v15 = vld [vmem:[%s884_s3 + $0x18] sm:$0xff]  ;;  %v589_v16 = vld [vmem:[%s884_s3 + $0x28] sm:$0xff] }
  0x97   :  { %v591_v17 = vld [vmem:[%s884_s3 + $0x38] sm:$0xff] }
  0x98   :  { %v244_v21 = vadd.f32 %v211_v6, %v132_v20  ;;  %v259_v22 = vmax.f32 %v243_v19, 0.0 }
  0x9a   :  { %v260_v23 = vmax.f32 %v244_v21, 0.0 }
  0x9c   :  { %v286_v24 = vpack.c.bf16 %v260_v23, %v259_v22  ;;  %v181_v50 = vpop.permute.xlu2 %180 }
  0x9d   :  { %v86_v25 = vpop.permute.xlu1 %85  ;;  %v81_v26 = vpop.permute.xlu0 %80 }
  0x9e   :  { %339 = vmatpush.bf16.msra.mxu0 %v286_v24  ;;  %598 = vmatpush.bf16.msra.mxu1 %v286_v24  ;;  %v129_v28 = vmul.f32 %v818_v48, %v81_v26  ;;  %v130_v29 = vmul.f32 %v818_v48, %v86_v25 }
  0x9f   :  { %599 = vmatpush.bf16.msra.mxu2 %v286_v24  ;;  %600 = vmatpush.bf16.msra.mxu3 %v286_v24 }
  0xa0   :  { %v241_v30 = vadd.f32 %v196_v18, %v129_v28 }
  0xa2   :  { %v257_v34 = vmax.f32 %v241_v30, 0.0 }
  0xa4   :  { %v171_v2 = vpop.permute.xlu2 %170 }
  0xa5   :  { %v71_v31 = vpop.permute.xlu1 %70  ;;  %v201_v32 = vpop.permute.xlu0 %200 }
  0xa6   :  { %v242_v33 = vadd.f32 %v201_v32, %v130_v29  ;;  %v127_v39 = vmul.f32 %v818_v48, %v71_v31 }
  0xa8   :  { %v258_v35 = vmax.f32 %v242_v33, 0.0 }
  0xaa   :  { %v285_v37 = vpack.c.bf16 %v258_v35, %v257_v34 }
  0xac   :  { %340 = vmatpush.bf16.msra.mxu0 %v285_v37  ;;  %601 = vmatpush.bf16.msra.mxu1 %v285_v37  ;;  %v421_v18 = vpop.permute.xlu2 %420 }
  0xad   :  { %602 = vmatpush.bf16.msra.mxu2 %v285_v37  ;;  %603 = vmatpush.bf16.msra.mxu3 %v285_v37  ;;  %v191_v40 = vpop.permute.xlu1 %190  ;;  %v186_v41 = vpop.permute.xlu0 %185 }
  0xae   :  { %v240_v42 = vadd.f32 %v191_v40, %v128_v38  ;;  %v239_v43 = vadd.f32 %v186_v41, %v127_v39 }
  0xb0   :  { %v256_v44 = vmax.f32 %v240_v42, 0.0  ;;  %v255_v45 = vmax.f32 %v239_v43, 0.0 }
  0xb2   :  { %v284_v46 = vpack.c.bf16 %v256_v44, %v255_v45 }
  0xb4   :  { %341 = vmatpush.bf16.msra.mxu0 %v284_v46  ;;  %604 = vmatpush.bf16.msra.mxu1 %v284_v46  ;;  %v436_v26 = vpop.permute.xlu2 %435 }
  0xb5   :  { %605 = vmatpush.bf16.msra.mxu2 %v284_v46  ;;  %606 = vmatpush.bf16.msra.mxu3 %v284_v46  ;;  %v176_v52 = vpop.permute.xlu1 %175  ;;  %v66_v53 = vpop.permute.xlu0 %65 }
  0xb6   :  { %v237_v54 = vadd.f32 %v176_v52, %v125_v47  ;;  %v126_v55 = vmul.f32 %v818_v48, %v66_v53 }
  0xb8   :  { %v238_v56 = vadd.f32 %v181_v50, %v126_v55  ;;  %v253_v57 = vmax.f32 %v237_v54, 0.0 }
  0xba   :  { %v254_v59 = vmax.f32 %v238_v56, 0.0 }
  0xbc   :  { %v283_v61 = vpack.c.bf16 %v254_v59, %v253_v57  ;;  %v451_v36 = vpop.permute.xlu2 %450 }
  0xbd   :  { %v166_v62 = vpop.permute.xlu1 %165  ;;  %v56_v63 = vpop.permute.xlu0 %55 }
  0xbe   :  { %v235_v0 = vadd.f32 %v166_v62, %v123_v60  ;;  %v124_v1 = vmul.f32 %v818_v48, %v56_v63  ;;  %342 = vmatpush.bf16.msra.mxu0 %v283_v61  ;;  %607 = vmatpush.bf16.msra.mxu1 %v283_v61 }
  0xbf   :  { %608 = vmatpush.bf16.msra.mxu2 %v283_v61  ;;  %609 = vmatpush.bf16.msra.mxu3 %v283_v61 }
  0xc0   :  { %v236_v3 = vadd.f32 %v171_v2, %v124_v1  ;;  %v251_v4 = vmax.f32 %v235_v0, 0.0 }
  0xc2   :  { %v252_v5 = vmax.f32 %v236_v3, 0.0 }
  0xc4   :  { %v282_v6 = vpack.c.bf16 %v252_v5, %v251_v4  ;;  %v466_v59 = vpop.permute.xlu2 %465 }
  0xc5   :  { %v161_v7 = vpop.permute.xlu1 %160  ;;  %v156_v8 = vpop.permute.xlu0 %155 }
  0xc6   :  { %v234_v9 = vadd.f32 %v161_v7, %v835_v58  ;;  %v233_v49 = vadd.f32 %v156_v8, %v823_v51  ;;  %343 = vmatpush.bf16.msra.mxu0 %v282_v6  ;;  %610 = vmatpush.bf16.msra.mxu1 %v282_v6  ;;  %v588_v51 = vld [vmem:[%s884_s3 + $0x20] sm:$0xff]  ;;  %v590_v58 = vld [vmem:[%s884_s3 + $0x30] sm:$0xff]  ;;  %s649_s3 = smov [#allocation2]  }
  0xc7   :  { %611 = vmatpush.bf16.msra.mxu2 %v282_v6  ;;  %612 = vmatpush.bf16.msra.mxu3 %v282_v6  ;;  %s541_s26 = sshll.u32 %s649_s3, 4  ;;  %s542_s26 = int_to_ptr.vmem [resolvable:$true] %s541_s26 }
  0xc8   :  { %v250_v48 = vmax.f32 %v234_v9, 0.0  ;;  %v249_v10 = vmax.f32 %v233_v49, 0.0 }
  0xca   :  { %v281_v11 = vpack.c.bf16 %v250_v48, %v249_v10 }
  0xcc   :  { %344 = vmatpush.bf16.msra.mxu0 %v281_v11  ;;  %613 = vmatpush.bf16.msra.mxu1 %v281_v11 }
  0xcd   :  { %614 = vmatpush.bf16.msra.mxu2 %v281_v11  ;;  %615 = vmatpush.bf16.msra.mxu3 %v281_v11  ;;  %v426_v21 = vpop.permute.xlu0 %425  ;;  %v431_v22 = vpop.permute.xlu1 %430 }
  0xcf   :  { %345 = vmatmul.bf16.vlgmr.msra.gmra.mxu0 %v584_v12  ;;  %355 = vmatmul.bf16.vlgmr.msra.gmra.mxu1 %v586_v13  ;;  %v481_v13 = vpop.permute.xlu2 %480 }
  0xd0   :  { %365 = vmatmul.bf16.vlgmr.msra.gmra.mxu2 %v588_v51  ;;  %375 = vmatmul.bf16.vlgmr.msra.gmra.mxu3 %v590_v58 }
  0xd5   :  { %v441_v28 = vpop.permute.xlu0 %440  ;;  %v446_v32 = vpop.permute.xlu1 %445 }
  0xdd   :  { %v456_v45 = vpop.permute.xlu0 %455  ;;  %v461_v53 = vpop.permute.xlu1 %460 }
  0xdf   :  { %350 = vmatmul.bf16.gmra.mxu0 %v585_v14  ;;  %360 = vmatmul.bf16.gmra.mxu1 %v587_v15 }
  0xe0   :  { %370 = vmatmul.bf16.gmra.mxu2 %v589_v16  ;;  %380 = vmatmul.bf16.gmra.mxu3 %v591_v17 }
  0xe5   :  { %v471_v6 = vpop.permute.xlu0 %470  ;;  %v476_v48 = vpop.permute.xlu1 %475 }
 0x14c   :  { %v346_v19 = vpop.f32.mrf.mxu0  ;;  %v356_v20 = vpop.f32.mrf.mxu1 }
 0x14d   :  { %v386_v34 = vmax.f32 %v346_v19, 0.0  ;;  %v390_v42 = vmax.f32 %v356_v20, 0.0 }
 0x14f   :  { %v498_v38 = vmul.f32 %v421_v18, %v386_v34  ;;  %v502_v55 = vmul.f32 %v441_v28, %v390_v42 }
 0x153   :  { %v366_v23 = vpop.f32.mrf.mxu2  ;;  %v376_v27 = vpop.f32.mrf.mxu3 }
 0x154   :  { %v348_v24 = vpop.f32.mrf.mxu0  ;;  %v358_v25 = vpop.f32.mrf.mxu1  ;;  %v394_v63 = vmax.f32 %v366_v23, 0.0  ;;  %v398_v51 = vmax.f32 %v376_v27, 0.0 }
 0x155   :  { %v387_v31 = vmax.f32 %v348_v24, 0.0  ;;  %v391_v47 = vmax.f32 %v358_v25, 0.0 }
 0x156   :  { %v506_v8 = vmul.f32 %v461_v53, %v394_v63  ;;  %v510_v19 = vmul.f32 %v481_v13, %v398_v51 }
 0x157   :  { %v499_v37 = vmul.f32 %v426_v21, %v387_v31  ;;  %v503_v60 = vmul.f32 %v446_v32, %v391_v47 }
 0x159   :  { %v514_v43 = vadd.f32 %v499_v37, %v498_v38 }
 0x15b   :  { %v368_v29 = vpop.f32.mrf.mxu2  ;;  %v378_v40 = vpop.f32.mrf.mxu3 }
 0x15c   :  { %v351_v30 = vpop.f32.mrf.mxu0  ;;  %v361_v33 = vpop.f32.mrf.mxu1  ;;  %v395_v3 = vmax.f32 %v368_v29, 0.0  ;;  %v399_v15 = vmax.f32 %v378_v40, 0.0 }
 0x15d   :  { %v388_v35 = vmax.f32 %v351_v30, 0.0  ;;  %v392_v56 = vmax.f32 %v361_v33, 0.0  ;;  %v496_v30 = vpop.permute.xlu2 %495 }
 0x15e   :  { %v507_v10 = vmul.f32 %v466_v59, %v395_v3 }
 0x15f   :  { %v500_v39 = vmul.f32 %v431_v22, %v388_v35  ;;  %v504_v0 = vmul.f32 %v451_v36, %v392_v56  ;;  %v486_v22 = vpop.permute.xlu0 %485 }
 0x160   :  { %v511_v23 = vmul.f32 %v486_v22, %v399_v15 }
 0x161   :  { %v515_v50 = vadd.f32 %v514_v43, %v500_v39 }
 0x163   :  { %v371_v46 = vpop.f32.mrf.mxu2  ;;  %v381_v2 = vpop.f32.mrf.mxu3 }
 0x164   :  { %v353_v41 = vpop.f32.mrf.mxu0  ;;  %v363_v54 = vpop.f32.mrf.mxu1  ;;  %v396_v9 = vmax.f32 %v371_v46, 0.0  ;;  %v400_v20 = vmax.f32 %v381_v2, 0.0 }
 0x165   :  { %v389_v44 = vmax.f32 %v353_v41, 0.0  ;;  %v393_v62 = vmax.f32 %v363_v54, 0.0 }
 0x166   :  { %v508_v58 = vmul.f32 %v471_v6, %v396_v9 }
 0x167   :  { %v501_v52 = vmul.f32 %v436_v26, %v389_v44  ;;  %v505_v4 = vmul.f32 %v456_v45, %v393_v62  ;;  %v491_v26 = vpop.permute.xlu1 %490 }
 0x168   :  { %v512_v28 = vmul.f32 %v491_v26, %v400_v20 }
 0x169   :  { %v516_v57 = vadd.f32 %v515_v50, %v501_v52 }
 0x16b   :  { %v517_v61 = vadd.f32 %v516_v57, %v502_v55  ;;  %v373_v7 = vpop.f32.mrf.mxu2  ;;  %v383_v18 = vpop.f32.mrf.mxu3 }
 0x16c   :  { %v397_v12 = vmax.f32 %v373_v7, 0.0  ;;  %v401_v25 = vmax.f32 %v383_v18, 0.0 }
 0x16d   :  { %v518_v1 = vadd.f32 %v517_v61, %v503_v60 }
 0x16e   :  { %v509_v16 = vmul.f32 %v476_v48, %v397_v12  ;;  %v513_v31 = vmul.f32 %v496_v30, %v401_v25 }
 0x16f   :  { %v519_v5 = vadd.f32 %v518_v1, %v504_v0 }
 0x171   :  { %v520_v49 = vadd.f32 %v519_v5, %v505_v4 }
 0x173   :  { %v521_v11 = vadd.f32 %v520_v49, %v506_v8 }
 0x175   :  { %v522_v14 = vadd.f32 %v521_v11, %v507_v10 }
 0x177   :  { %v523_v17 = vadd.f32 %v522_v14, %v508_v58 }
 0x179   :  { %v524_v21 = vadd.f32 %v523_v17, %v509_v16 }
 0x17b   :  { %v525_v24 = vadd.f32 %v524_v21, %v510_v19 }
 0x17d   :  { %v526_v29 = vadd.f32 %v525_v24, %v511_v23 }
 0x17f   :  { %v527_v32 = vadd.f32 %v526_v29, %v512_v28 }
 0x181   :  { %v528_v27 = vadd.f32 %v527_v32, %v513_v31 }
 0x183   :  { %v529_v33 = vrot.slane %v528_v27, 4 }
 0x185   :  { %v530_v34 = vadd.f32 %v529_v33, %v528_v27 }
 0x187   :  { %v531_v35 = vrot.slane %v530_v34, 2 }
 0x189   :  { %v532_v36 = vadd.f32 %v531_v35, %v530_v34 }
 0x18b   :  { %v533_v37 = vrot.slane %v532_v36, 1 }
 0x18d   :  { %v534_v38 = vadd.f32 %v533_v37, %v532_v36 }
 0x18f   :  { %535 = vst [vmem:[#allocation2] sm:$0x1] %v534_v38 }
 0x190   :  { %546 = dma.vmem_to_hbm [thread:$0]  %s542_s26, 16, %s544_s29, [#allocation3]  }
 0x191   :  { %646 = dma.done.wait [#allocation3], 16  }
 0x192   :  { %647 = vsyncadd [#allocation3], 4294967280 }
 0x193   :  { %551 = vsyncpa [#allocation3], 1 }

</bundles_post_ra>
